<compile_context>
chip_gen: v5e
topology: v5e:2x2
jax: 0.10.0
libtpu: 0.0.40
codegen_flags: <defaults>
</compile_context>

<pallas_src>
import functools

import jax
import jax.numpy as jnp
from jax.experimental import pallas as pl
from jax.experimental.pallas import tpu as pltpu


def _partial_kernel(preds_ref, targets_ref, out_ref,
                    inter_ref, psum_ref, ohsum_ref, ohlog_ref,
                    *, p_total, tile, needs_mask):
    # preds_ref:   (N, C, TP) f32 logits for this pixel tile
    # targets_ref: (N, TP)    i32 labels (may contain 255 / out-of-range)
    # out_ref:     (1, 4, N, C) f32 partial sums for this parallel chunk
    # *_ref scratch: (N, C)   f32 running accumulators
    g = pl.program_id(0)
    k = pl.program_id(1)
    nk = pl.num_programs(1)

    @pl.when(k == 0)
    def _init():
        inter_ref[...] = jnp.zeros_like(inter_ref)
        psum_ref[...] = jnp.zeros_like(psum_ref)
        ohsum_ref[...] = jnp.zeros_like(ohsum_ref)
        ohlog_ref[...] = jnp.zeros_like(ohlog_ref)

    x = preds_ref[...]                                  # (N, C, TP)
    t = targets_ref[...]                                # (N, TP)
    N, C, TP = x.shape

    if needs_mask:
        # logical (unclamped) tile index -> mask lanes past the image end,
        # including fully-padded tiles whose DMA index was clamped.
        tile_idx = g * nk + k
        pix = jax.lax.broadcasted_iota(jnp.int32, (1, 1, TP), 2) + tile_idx * tile
        lane_ok = pix < p_total                         # (1, 1, TP) bool
        x = jnp.where(lane_ok, x, 0.0)

    # --- softmax over the channel axis (PyTorch dim=1) ---
    m = jnp.max(x, axis=1, keepdims=True)
    e = jnp.exp(x - m)
    s = jnp.sum(e, axis=1, keepdims=True)
    p = e / s                                           # (N, C, TP)

    # --- one-hot of masked targets; out-of-range / 255 mapped to class 0 ---
    valid = jnp.logical_and(t >= 0, t < C)
    tm = jnp.where(valid, t, jnp.zeros_like(t))         # (N, TP)
    cidx = jax.lax.broadcasted_iota(jnp.int32, (N, C, TP), 1)
    ohb = cidx == tm[:, None, :]
    if needs_mask:
        ohb = jnp.logical_and(ohb, lane_ok)
    oh = ohb.astype(jnp.float32)                        # (N, C, TP)

    # --- partial Dice sums (reuse p*oh for both Dice and CE) ---
    pe = p * oh                                         # p at the target class
    inter_ref[...] += jnp.sum(pe, axis=2)               # (N, C)
    if needs_mask:
        psum_ref[...] += jnp.sum(jnp.where(lane_ok, p, 0.0), axis=2)
    else:
        psum_ref[...] += jnp.sum(p, axis=2)
    ohsum_ref[...] += jnp.sum(oh, axis=2)

    # --- weighted CE on the already-softmaxed probs (as in the module) ---
    # nll = log(sum_c exp(p_c)) - p_target ; p in [0,1] -> no max-shift needed
    lse = jnp.log(jnp.sum(jnp.exp(p), axis=1))          # (N, TP)
    ohlog_ref[...] += jnp.sum(oh * lse[:, None, :], axis=2)

    @pl.when(k == nk - 1)
    def _finalize():
        out_ref[0, 0] = inter_ref[...]
        out_ref[0, 1] = psum_ref[...]
        out_ref[0, 2] = ohsum_ref[...]
        out_ref[0, 3] = ohlog_ref[...]


def _default_tile_pixels(N, C):
    # live per-pixel bytes: ~2x double-buffered input block + ~6 block-sized
    # temporaries (e, p, oh, pe, exp(p), products) + the targets block.
    budget = 24 * 1024 * 1024          # conservative, v7x-safe (64 MiB VMEM)
    per_pix = 8 * N * C * 4 + 4 * N * 4
    tp = budget // per_pix
    return max(128, (tp // 128) * 128)


@functools.partial(jax.jit, static_argnames=("smooth", "tile_pixels"))
def weighted_dice_ce_loss(preds, targets, class_weights, smooth=1e-6,
                          tile_pixels=None):
    """preds: (N, C, H, W) f32 logits; targets: (N, H, W) int labels."""
    N, C, H, W = preds.shape
    P = H * W
    preds3 = preds.reshape(N, C, P).astype(jnp.float32)
    targets2 = targets.reshape(N, P).astype(jnp.int32)

    if tile_pixels is None:
        tile_pixels = _default_tile_pixels(N, C)
        # Prefer >= ~8 pixel tiles (>= 4 per core) so the DMA pipeline has
        # something to overlap, but never shrink tiles below 2048 lanes.
        overlap_tp = max(2048, ((-(-P // 8) + 127) // 128) * 128)
        tile_pixels = min(tile_pixels, overlap_tp)
    TP = int(tile_pixels)
    if TP >= P:
        TP = P                                   # full extent: no 128 constraint
    else:
        TP = max(128, (TP // 128) * 128)         # lane-aligned tile
    nk_total = -(-P // TP)                       # real pixel tiles

    # Megacore split: two parallel chunks of the pixel-tile range (v7x / v5p
    # get one per TensorCore; harmless serial loop on v5e / v6e).
    G = 2 if nk_total >= 2 else 1
    nk = -(-nk_total // G)                       # reduction steps per chunk
    padded = (G * nk != nk_total)                # some tiles fully past the end
    needs_mask = (G * nk * TP != P)

    if padded:
        def pix_block(g, k):
            # clamp fully out-of-range tiles onto the last real tile so the
            # generated DMA is always in-bounds; the kernel lane-mask zeroes
            # their contribution.
            return jnp.minimum(g * nk + k, nk_total - 1)
    else:
        def pix_block(g, k):
            return g * nk + k

    kernel = functools.partial(
        _partial_kernel, p_total=P, tile=TP, needs_mask=needs_mask)

    parts = pl.pallas_call(
        kernel,
        out_shape=jax.ShapeDtypeStruct((G, 4, N, C), jnp.float32),
        grid_spec=pltpu.PrefetchScalarGridSpec(
            num_scalar_prefetch=0,
            grid=(G, nk),
            in_specs=[
                pl.BlockSpec((N, C, TP), lambda g, k: (0, 0, pix_block(g, k))),
                pl.BlockSpec((N, TP), lambda g, k: (0, pix_block(g, k))),
            ],
            out_specs=pl.BlockSpec((1, 4, N, C), lambda g, k: (g, 0, 0, 0)),
            scratch_shapes=[
                pltpu.VMEM((N, C), jnp.float32),   # sum p * one_hot
                pltpu.VMEM((N, C), jnp.float32),   # sum p
                pltpu.VMEM((N, C), jnp.float32),   # sum one_hot (class counts)
                pltpu.VMEM((N, C), jnp.float32),   # sum one_hot * logsumexp(p)
            ]),
        compiler_params=pltpu.CompilerParams(
            dimension_semantics=("parallel", "arbitrary"),
            vmem_limit_bytes=48 * 1024 * 1024),
        cost_estimate=pl.CostEstimate(
            flops=12 * N * C * P,
            transcendentals=2 * N * C * P + N * P,
            bytes_accessed=(N * C * P + N * P) * 4 + G * 4 * N * C * 4),
    )(preds3, targets2)

    # --- tiny O(N*C) epilogue: Dice formula + class-weighted CE coupling ---
    sums = jnp.sum(parts, axis=0)                        # (4, N, C)
    inter, psum, ohsum, ohlog = sums[0], sums[1], sums[2], sums[3]
    union = psum + ohsum
    dice = 1.0 - (2.0 * inter + float(smooth)) / (union + float(smooth))
    dice_mean = jnp.mean(dice)
    w = jnp.asarray(class_weights, jnp.float32).reshape(1, C)
    # sum_pix w[t]*nll = sum_{n,c} w_c * (ohlog[n,c] - inter[n,c])
    ce_num = jnp.sum(w * (ohlog - inter))
    ce_den = jnp.sum(w * ohsum)
    return dice_mean + ce_num / ce_den


def reference_loss(preds, targets, class_weights, smooth=1e-6):
    """Pure-JAX mirror of the PyTorch module, for verification."""
    C = preds.shape[1]
    p = jax.nn.softmax(preds, axis=1)
    valid = (targets >= 0) & (targets < C)
    t = jnp.where(valid, targets, 0)
    oh = jax.nn.one_hot(t, C, dtype=jnp.float32).transpose(0, 3, 1, 2)
    inter = jnp.sum(p * oh, axis=(2, 3))
    union = jnp.sum(p, axis=(2, 3)) + jnp.sum(oh, axis=(2, 3))
    dice = 1.0 - (2.0 * inter + smooth) / (union + smooth)
    lsm = jax.nn.log_softmax(p, axis=1)
    nll = -jnp.take_along_axis(lsm, t[:, None, :, :], axis=1)[:, 0]
    w = class_weights[t]
    ce = jnp.sum(w * nll) / jnp.sum(w)
    return dice.mean() + ce


if __name__ == "__main__":
    N, C, H, W = 2, 4, 16, 16
    key = jax.random.PRNGKey(0)
    k_pred, k_tgt = jax.random.split(key)

    preds = jax.random.normal(k_pred, (N, C, H, W), dtype=jnp.float32)
    # labels in [0, 5): value 4 is out-of-range, exercising the valid-mask path
    targets = jax.random.randint(k_tgt, (N, H, W), 0, C + 1, dtype=jnp.int32)
    # sprinkle some 255 "ignore" labels (the module maps them to class 0)
    targets = targets.at[0, 0, :4].set(255)
    class_weights = jnp.array([1.0, 2.0, 0.5, 1.5], dtype=jnp.float32)

    ref = jax.block_until_ready(reference_loss(preds, targets, class_weights))

    # 1) single-tile path (TP == P, grid (1, 1))
    loss = jax.block_until_ready(
        weighted_dice_ce_loss(preds, targets, class_weights))
    assert jnp.allclose(loss, ref, rtol=1e-5, atol=1e-5), (loss, ref)

    # 2) two parallel chunks x 1 tile of 128 (exercises the megacore split)
    loss_tiled = jax.block_until_ready(
        weighted_dice_ce_loss(preds, targets, class_weights, tile_pixels=128))
    assert jnp.allclose(loss_tiled, ref, rtol=1e-5, atol=1e-5), (loss_tiled, ref)

    # 3) ragged spatial size -> masked partial tile + clamped padded tile
    H2, W2 = 18, 18
    preds2 = jax.random.normal(k_pred, (N, C, H2, W2), dtype=jnp.float32)
    targets2 = jax.random.randint(k_tgt, (N, H2, W2), 0, C + 1, dtype=jnp.int32)
    ref2 = jax.block_until_ready(reference_loss(preds2, targets2, class_weights))
    loss2 = jax.block_until_ready(
        weighted_dice_ce_loss(preds2, targets2, class_weights, tile_pixels=128))
    assert jnp.allclose(loss2, ref2, rtol=1e-5, atol=1e-5), (loss2, ref2)

    print("KERNEL_OK")
</pallas_src>

<mosaic_0001>
module attributes {stable_mosaic.version = 11 : i64} {
  func.func @_partial_kernel(%arg0: i32, %arg1: i32, %arg2: memref<2x4x256xf32, #tpu.memory_space<vmem>>, %arg3: memref<2x256xi32, #tpu.memory_space<vmem>>, %arg4: memref<1x4x2x4xf32, #tpu.memory_space<vmem>>, %arg5: memref<2x4xf32, #tpu.memory_space<vmem>>, %arg6: memref<2x4xf32, #tpu.memory_space<vmem>>, %arg7: memref<2x4xf32, #tpu.memory_space<vmem>>, %arg8: memref<2x4xf32, #tpu.memory_space<vmem>>) attributes {dimension_semantics = [#tpu.dimension_semantics<parallel>, #tpu.dimension_semantics<arbitrary>], iteration_bounds = array<i64: 1, 1>, scalar_prefetch = 0 : i64, scratch_operands = 4 : i64, tpu.core_type = #tpu.core_type<tc>, window_params = [{transform_indices = @transform_0, window_bounds = array<i64: 2, 4, 256>}, {transform_indices = @transform_1, window_bounds = array<i64: 2, 256>}, {transform_indices = @transform_2, window_bounds = array<i64: 1, 4, 2, 4>}]} {
    %c0_i32 = arith.constant 0 : i32
    %0 = arith.cmpi eq, %arg1, %c0_i32 : i32
    %1 = arith.extui %0 : i1 to i32
    %c0_i32_0 = arith.constant 0 : i32
    %2 = arith.cmpi ne, %1, %c0_i32_0 : i32
    scf.if %2 {
      %cst_31 = arith.constant 0.000000e+00 : f32
      %53 = vector.broadcast %cst_31 : f32 to vector<2x4xf32>
      %c0_32 = arith.constant 0 : index
      %c0_33 = arith.constant 0 : index
      %54 = vector.load %arg5[%c0_32, %c0_33] : memref<2x4xf32, #tpu.memory_space<vmem>>, vector<2x4xf32>
      tpu.vector_store %arg5[%c0_32, %c0_33], %53 {strides = array<i32>} : memref<2x4xf32, #tpu.memory_space<vmem>>, vector<2x4xf32>,
      %cst_34 = arith.constant 0.000000e+00 : f32
      %55 = vector.broadcast %cst_34 : f32 to vector<2x4xf32>
      %c0_35 = arith.constant 0 : index
      %c0_36 = arith.constant 0 : index
      %56 = vector.load %arg6[%c0_35, %c0_36] : memref<2x4xf32, #tpu.memory_space<vmem>>, vector<2x4xf32>
      tpu.vector_store %arg6[%c0_35, %c0_36], %55 {strides = array<i32>} : memref<2x4xf32, #tpu.memory_space<vmem>>, vector<2x4xf32>,
      %cst_37 = arith.constant 0.000000e+00 : f32
      %57 = vector.broadcast %cst_37 : f32 to vector<2x4xf32>
      %c0_38 = arith.constant 0 : index
      %c0_39 = arith.constant 0 : index
      %58 = vector.load %arg7[%c0_38, %c0_39] : memref<2x4xf32, #tpu.memory_space<vmem>>, vector<2x4xf32>
      tpu.vector_store %arg7[%c0_38, %c0_39], %57 {strides = array<i32>} : memref<2x4xf32, #tpu.memory_space<vmem>>, vector<2x4xf32>,
      %cst_40 = arith.constant 0.000000e+00 : f32
      %59 = vector.broadcast %cst_40 : f32 to vector<2x4xf32>
      %c0_41 = arith.constant 0 : index
      %c0_42 = arith.constant 0 : index
      %60 = vector.load %arg8[%c0_41, %c0_42] : memref<2x4xf32, #tpu.memory_space<vmem>>, vector<2x4xf32>
      tpu.vector_store %arg8[%c0_41, %c0_42], %59 {strides = array<i32>} : memref<2x4xf32, #tpu.memory_space<vmem>>, vector<2x4xf32>,
    } else {
    }
    %c0 = arith.constant 0 : index
    %c0_1 = arith.constant 0 : index
    %c0_2 = arith.constant 0 : index
    %3 = vector.load %arg2[%c0, %c0_1, %c0_2] : memref<2x4x256xf32, #tpu.memory_space<vmem>>, vector<2x4x256xf32>
    %c0_3 = arith.constant 0 : index
    %c0_4 = arith.constant 0 : index
    %4 = vector.load %arg3[%c0_3, %c0_4] : memref<2x256xi32, #tpu.memory_space<vmem>>, vector<2x256xi32>
    %cst = arith.constant dense<0xFF800000> : vector<2x256xf32>
    %5 = vector.multi_reduction <maximumf>, %3, %cst [1] : vector<2x4x256xf32> to vector<2x256xf32>
    %6 = vector.shape_cast %5 : vector<2x256xf32> to vector<2x1x256xf32>
    %7 = vector.broadcast %6 : vector<2x1x256xf32> to vector<2x4x256xf32>
    %8 = arith.subf %3, %7 : vector<2x4x256xf32>
    %9 = math.exp %8 : vector<2x4x256xf32>
    %cst_5 = arith.constant dense<0.000000e+00> : vector<2x256xf32>
    %10 = vector.multi_reduction <add>, %9, %cst_5 [1] : vector<2x4x256xf32> to vector<2x256xf32>
    %11 = vector.shape_cast %10 : vector<2x256xf32> to vector<2x1x256xf32>
    %12 = vector.broadcast %11 : vector<2x1x256xf32> to vector<2x4x256xf32>
    %13 = arith.divf %9, %12 : vector<2x4x256xf32>
    %c0_i32_6 = arith.constant 0 : i32
    %14 = vector.broadcast %c0_i32_6 : i32 to vector<2x256xi32>
    %15 = arith.cmpi sge, %4, %14 : vector<2x256xi32>
    %c4_i32 = arith.constant 4 : i32
    %16 = vector.broadcast %c4_i32 : i32 to vector<2x256xi32>
    %17 = arith.cmpi slt, %4, %16 : vector<2x256xi32>
    %18 = arith.andi %15, %17 : vector<2x256xi1>
    %c0_i32_7 = arith.constant 0 : i32
    %19 = vector.broadcast %c0_i32_7 : i32 to vector<2x256xi32>
    %20 = arith.select %18, %4, %19 : vector<2x256xi1>, vector<2x256xi32>
    %21 = tpu.iota {dimensions = array<i32: 1>} : vector<2x4x256xi32>
    %22 = vector.shape_cast %20 : vector<2x256xi32> to vector<2x1x256xi32>
    %23 = vector.broadcast %22 : vector<2x1x256xi32> to vector<2x4x256xi32>
    %24 = arith.cmpi eq, %21, %23 : vector<2x4x256xi32>
    %25 = arith.extui %24 : vector<2x4x256xi1> to vector<2x4x256xi32>
    %26 = arith.sitofp %25 : vector<2x4x256xi32> to vector<2x4x256xf32>
    %27 = arith.mulf %13, %26 : vector<2x4x256xf32>
    %c0_8 = arith.constant 0 : index
    %c0_9 = arith.constant 0 : index
    %28 = vector.load %arg5[%c0_8, %c0_9] : memref<2x4xf32, #tpu.memory_space<vmem>>, vector<2x4xf32>
    %cst_10 = arith.constant dense<0.000000e+00> : vector<2x4xf32>
    %29 = vector.multi_reduction <add>, %27, %cst_10 [2] : vector<2x4x256xf32> to vector<2x4xf32>
    %30 = arith.addf %28, %29 : vector<2x4xf32>
    %c0_11 = arith.constant 0 : index
    %c0_12 = arith.constant 0 : index
    %31 = vector.load %arg5[%c0_11, %c0_12] : memref<2x4xf32, #tpu.memory_space<vmem>>, vector<2x4xf32>
    tpu.vector_store %arg5[%c0_11, %c0_12], %30 {strides = array<i32>} : memref<2x4xf32, #tpu.memory_space<vmem>>, vector<2x4xf32>,
    %c0_13 = arith.constant 0 : index
    %c0_14 = arith.constant 0 : index
    %32 = vector.load %arg6[%c0_13, %c0_14] : memref<2x4xf32, #tpu.memory_space<vmem>>, vector<2x4xf32>
    %cst_15 = arith.constant dense<0.000000e+00> : vector<2x4xf32>
    %33 = vector.multi_reduction <add>, %13, %cst_15 [2] : vector<2x4x256xf32> to vector<2x4xf32>
    %34 = arith.addf %32, %33 : vector<2x4xf32>
    %c0_16 = arith.constant 0 : index
    %c0_17 = arith.constant 0 : index
    %35 = vector.load %arg6[%c0_16, %c0_17] : memref<2x4xf32, #tpu.memory_space<vmem>>, vector<2x4xf32>
    tpu.vector_store %arg6[%c0_16, %c0_17], %34 {strides = array<i32>} : memref<2x4xf32, #tpu.memory_space<vmem>>, vector<2x4xf32>,
    %c0_18 = arith.constant 0 : index
    %c0_19 = arith.constant 0 : index
    %36 = vector.load %arg7[%c0_18, %c0_19] : memref<2x4xf32, #tpu.memory_space<vmem>>, vector<2x4xf32>
    %cst_20 = arith.constant dense<0.000000e+00> : vector<2x4xf32>
    %37 = vector.multi_reduction <add>, %26, %cst_20 [2] : vector<2x4x256xf32> to vector<2x4xf32>
    %38 = arith.addf %36, %37 : vector<2x4xf32>
    %c0_21 = arith.constant 0 : index
    %c0_22 = arith.constant 0 : index
    %39 = vector.load %arg7[%c0_21, %c0_22] : memref<2x4xf32, #tpu.memory_space<vmem>>, vector<2x4xf32>
    tpu.vector_store %arg7[%c0_21, %c0_22], %38 {strides = array<i32>} : memref<2x4xf32, #tpu.memory_space<vmem>>, vector<2x4xf32>,
    %40 = math.exp %13 : vector<2x4x256xf32>
    %cst_23 = arith.constant dense<0.000000e+00> : vector<2x256xf32>
    %41 = vector.multi_reduction <add>, %40, %cst_23 [1] : vector<2x4x256xf32> to vector<2x256xf32>
    %42 = math.log %41 : vector<2x256xf32>
    %c0_24 = arith.constant 0 : index
    %c0_25 = arith.constant 0 : index
    %43 = vector.load %arg8[%c0_24, %c0_25] : memref<2x4xf32, #tpu.memory_space<vmem>>, vector<2x4xf32>
    %44 = vector.shape_cast %42 : vector<2x256xf32> to vector<2x1x256xf32>
    %45 = vector.broadcast %44 : vector<2x1x256xf32> to vector<2x4x256xf32>
    %46 = arith.mulf %26, %45 : vector<2x4x256xf32>
    %cst_26 = arith.constant dense<0.000000e+00> : vector<2x4xf32>
    %47 = vector.multi_reduction <add>, %46, %cst_26 [2] : vector<2x4x256xf32> to vector<2x4xf32>
    %48 = arith.addf %43, %47 : vector<2x4xf32>
    %c0_27 = arith.constant 0 : index
    %c0_28 = arith.constant 0 : index
    %49 = vector.load %arg8[%c0_27, %c0_28] : memref<2x4xf32, #tpu.memory_space<vmem>>, vector<2x4xf32>
    tpu.vector_store %arg8[%c0_27, %c0_28], %48 {strides = array<i32>} : memref<2x4xf32, #tpu.memory_space<vmem>>, vector<2x4xf32>,
    %c0_i32_29 = arith.constant 0 : i32
    %50 = arith.cmpi eq, %arg1, %c0_i32_29 : i32
    %51 = arith.extui %50 : i1 to i32
    %c0_i32_30 = arith.constant 0 : i32
    %52 = arith.cmpi ne, %51, %c0_i32_30 : i32
    scf.if %52 {
      %c0_31 = arith.constant 0 : index
      %c0_32 = arith.constant 0 : index
      %53 = vector.load %arg5[%c0_31, %c0_32] : memref<2x4xf32, #tpu.memory_space<vmem>>, vector<2x4xf32>
      %c0_33 = arith.constant 0 : index
      %c0_34 = arith.constant 0 : index
      %c0_35 = arith.constant 0 : index
      %c0_36 = arith.constant 0 : index
      %54 = vector.load %arg4[%c0_33, %c0_34, %c0_35, %c0_36] : memref<1x4x2x4xf32, #tpu.memory_space<vmem>>, vector<1x1x2x4xf32>
      %55 = vector.shape_cast %54 : vector<1x1x2x4xf32> to vector<2x4xf32>
      %56 = vector.shape_cast %53 : vector<2x4xf32> to vector<1x1x2x4xf32>
      tpu.vector_store %arg4[%c0_33, %c0_34, %c0_35, %c0_36], %56 {strides = array<i32>} : memref<1x4x2x4xf32, #tpu.memory_space<vmem>>, vector<1x1x2x4xf32>,
      %c0_37 = arith.constant 0 : index
      %c0_38 = arith.constant 0 : index
      %57 = vector.load %arg6[%c0_37, %c0_38] : memref<2x4xf32, #tpu.memory_space<vmem>>, vector<2x4xf32>
      %c0_39 = arith.constant 0 : index
      %c1 = arith.constant 1 : index
      %c0_40 = arith.constant 0 : index
      %c0_41 = arith.constant 0 : index
      %58 = vector.load %arg4[%c0_39, %c1, %c0_40, %c0_41] : memref<1x4x2x4xf32, #tpu.memory_space<vmem>>, vector<1x1x2x4xf32>
      %59 = vector.shape_cast %58 : vector<1x1x2x4xf32> to vector<2x4xf32>
      %60 = vector.shape_cast %57 : vector<2x4xf32> to vector<1x1x2x4xf32>
      tpu.vector_store %arg4[%c0_39, %c1, %c0_40, %c0_41], %60 {strides = array<i32>} : memref<1x4x2x4xf32, #tpu.memory_space<vmem>>, vector<1x1x2x4xf32>,
      %c0_42 = arith.constant 0 : index
      %c0_43 = arith.constant 0 : index
      %61 = vector.load %arg7[%c0_42, %c0_43] : memref<2x4xf32, #tpu.memory_space<vmem>>, vector<2x4xf32>
      %c0_44 = arith.constant 0 : index
      %c2 = arith.constant 2 : index
      %c0_45 = arith.constant 0 : index
      %c0_46 = arith.constant 0 : index
      %62 = vector.load %arg4[%c0_44, %c2, %c0_45, %c0_46] : memref<1x4x2x4xf32, #tpu.memory_space<vmem>>, vector<1x1x2x4xf32>
      %63 = vector.shape_cast %62 : vector<1x1x2x4xf32> to vector<2x4xf32>
      %64 = vector.shape_cast %61 : vector<2x4xf32> to vector<1x1x2x4xf32>
      tpu.vector_store %arg4[%c0_44, %c2, %c0_45, %c0_46], %64 {strides = array<i32>} : memref<1x4x2x4xf32, #tpu.memory_space<vmem>>, vector<1x1x2x4xf32>,
      %c0_47 = arith.constant 0 : index
      %c0_48 = arith.constant 0 : index
      %65 = vector.load %arg8[%c0_47, %c0_48] : memref<2x4xf32, #tpu.memory_space<vmem>>, vector<2x4xf32>
      %c0_49 = arith.constant 0 : index
      %c3 = arith.constant 3 : index
      %c0_50 = arith.constant 0 : index
      %c0_51 = arith.constant 0 : index
      %66 = vector.load %arg4[%c0_49, %c3, %c0_50, %c0_51] : memref<1x4x2x4xf32, #tpu.memory_space<vmem>>, vector<1x1x2x4xf32>
      %67 = vector.shape_cast %66 : vector<1x1x2x4xf32> to vector<2x4xf32>
      %68 = vector.shape_cast %65 : vector<2x4xf32> to vector<1x1x2x4xf32>
      tpu.vector_store %arg4[%c0_49, %c3, %c0_50, %c0_51], %68 {strides = array<i32>} : memref<1x4x2x4xf32, #tpu.memory_space<vmem>>, vector<1x1x2x4xf32>,
    } else {
    }
    return
  }
  func.func @transform_0(%arg0: i32, %arg1: i32) -> (i32, i32, i32) {
    %c1_i32 = arith.constant 1 : i32
    %0 = arith.muli %arg0, %c1_i32 : i32
    %1 = arith.addi %0, %arg1 : i32
    %c0_i32 = arith.constant 0 : i32
    %c0_i32_0 = arith.constant 0 : i32
    %c0_i32_1 = arith.constant 0 : i32
    return %c0_i32, %c0_i32_0, %1 : i32, i32, i32
  }
  func.func @transform_1(%arg0: i32, %arg1: i32) -> (i32, i32) {
    %c1_i32 = arith.constant 1 : i32
    %0 = arith.muli %arg0, %c1_i32 : i32
    %1 = arith.addi %0, %arg1 : i32
    %c0_i32 = arith.constant 0 : i32
    %c0_i32_0 = arith.constant 0 : i32
    return %c0_i32, %1 : i32, i32
  }
  func.func @transform_2(%arg0: i32, %arg1: i32) -> (i32, i32, i32, i32) {
    %c0_i32 = arith.constant 0 : i32
    %c0_i32_0 = arith.constant 0 : i32
    %c0_i32_1 = arith.constant 0 : i32
    %c0_i32_2 = arith.constant 0 : i32
    return %arg0, %c0_i32, %c0_i32_0, %c0_i32_1 : i32, i32, i32, i32
  }
}

</mosaic_0001>

<bundles_post_ra>
// kernel: weighted_dice_ce_loss.1
= control target key start
LH: loop header
LB: loop body
LE: loop exit
PB: predicated region body
PF: predicated region fallthrough
CT: control target
= control target key end

     0   :  { %vm80_vm0 = vcmask 1043456   ;;  %vm215_vm4 = vcmask 1040384   ;;  %vm217_vm5 = vcmask 1042434   ;;  %vm221_vm6 = vcmask 1041409   ;;  %s602_s0 = inlined_call_operand.vmem [shape: f32[2,4,256], index: 0, kind: input, shape index: {}]   ;;  %s603_s1 = inlined_call_operand.vmem [shape: s32[2,256], index: 1, kind: input, shape index: {}]   ;;  %s604_s2 = inlined_call_operand.vmem [shape: f32[1,4,2,4], index: 2, kind: output, shape index: {}]  }
   0x1   :  { %v64_v0 = vld [vmem:[%s602_s0] sm:$0xff]  ;;  %v65_v1 = vld [vmem:[%s602_s0 + $0x8] sm:$0xff]  ;;  %vm223_vm7 = vcmask 1043459   ;;  %vm219_vm8 = vcmask 1041408   ;;  %vm225_vm9 = vcmask 1042433  }
   0x2   :  { %69 = vst [vmem:[#allocation1] ss:$2 sm:$0xff] %v64_v0  ;;  %v66_v42 = vld [vmem:[%s603_s1] sm:$0xf] }
   0x3   :  { %73 = vst [vmem:[#allocation1 + $0x10] ss:$2 sm:$0xff] %v65_v1  ;;  %vm206_vm1 = vcmp.ge.s32.totalorder %v66_v42, 0  ;;  %vm207_vm2 = vcmp.lt.s32.totalorder %v66_v42, 4 }
   0x4   :  { %vm208_vm3 = vmand %vm206_vm1, %vm207_vm2 }
   0x5   :  { %v209_v45 = vsel %vm208_vm3, %v66_v42, 0 }
   0x6   :  { %v212_v50 = vrot.slane %v209_v45, 1  ;;  %v213_v53 = vrot.slane %v209_v45, 2  ;;  %v214_v54 = vrot.slane %v209_v45, 3 }
   0x9   :  { %v70_v2 = vld.sshfl [vmem:[#allocation1] sm:$0xff pattern:$0x75316420]  ;;  %v71_v3 = vld.sshfl [vmem:[#allocation1 + $0x8] sm:$0xff pattern:$0x75316420] }
   0xa   :  { %v81_v4 = vsel %vm80_vm0, %v70_v2, -inf  ;;  %v88_v5 = vsel %vm80_vm0, %v71_v3, -inf  ;;  %v74_v6 = vld.sshfl [vmem:[#allocation1 + $0x10] sm:$0xff pattern:$0x75316420] }
   0xb   :  { %v82_v7 = vrot.slane %v81_v4, 4  ;;  %v89_v8 = vrot.slane %v88_v5, 4  ;;  %v75_v9 = vld.sshfl [vmem:[#allocation1 + $0x18] sm:$0xff pattern:$0x75316420]  ;;  %v95_v10 = vsel %vm80_vm0, %v74_v6, -inf }
   0xc   :  { %v96_v11 = vrot.slane %v95_v10, 4  ;;  %v102_v12 = vsel %vm80_vm0, %v75_v9, -inf  ;;  %v224_v9 = vsel %vm223_vm7, %v213_v53, %v214_v54 }
   0xd   :  { %v83_v13 = vmax.f32 %v81_v4, %v82_v7  ;;  %v90_v14 = vmax.f32 %v88_v5, %v89_v8  ;;  %v103_v15 = vrot.slane %v102_v12, 4  ;;  %v218_v5 = vsel %vm217_vm5, %v213_v53, %v214_v54 }
   0xe   :  { %v97_v16 = vmax.f32 %v95_v10, %v96_v11  ;;  %v222_v8 = vsel %vm221_vm6, %v209_v45, %v212_v50 }
   0xf   :  { %v84_v17 = vrot.slane %v83_v13, 2  ;;  %v91_v18 = vrot.slane %v90_v14, 2  ;;  %v104_v19 = vmax.f32 %v102_v12, %v103_v15 }
  0x10   :  { %v98_v20 = vrot.slane %v97_v16, 2 }
  0x11   :  { %v85_v21 = vmax.f32 %v83_v13, %v84_v17  ;;  %v92_v22 = vmax.f32 %v90_v14, %v91_v18  ;;  %v105_v23 = vrot.slane %v104_v19, 2  ;;  %v210_v13 = vlaneseq }
  0x12   :  { %v99_v24 = vmax.f32 %v97_v16, %v98_v20  ;;  %v226_v20 = vsel %vm225_vm9, %v222_v8, %v224_v9 }
  0x13   :  { %v86_v25 = vrot.slane %v85_v21, 1  ;;  %v93_v26 = vrot.slane %v92_v22, 1  ;;  %v106_v27 = vmax.f32 %v104_v19, %v105_v23  ;;  %v211_v23 = vshrl.u32 %v210_v13, 7 }
  0x14   :  { %v100_v28 = vrot.slane %v99_v24, 1 }
  0x15   :  { %v87_v29 = vmax.f32 %v85_v21, %v86_v25  ;;  %v94_v30 = vmax.f32 %v92_v22, %v93_v26  ;;  %v107_v31 = vrot.slane %v106_v27, 1 }
  0x16   :  { %v101_v33 = vmax.f32 %v99_v24, %v100_v28  ;;  %v227_v28 = vrot.slane %v226_v20, 1 }
  0x17   :  { %v113_v32 = vrot.slane %v94_v30, 4  ;;  %v108_v34 = vmax.f32 %v106_v27, %v107_v31 }
  0x19   :  { %v115_v35 = vsel %vm80_vm0, %v87_v29, %v113_v32  ;;  %v114_v36 = vrot.slane %v108_v34, 4  ;;  %v231_v32 = vperm.slane %v227_v28, 1  ;;  %v476_v34 = vmov 0.0  }
  0x1a   :  { %v119_v37 = vsub.f32 %v64_v0, %v115_v35 }
  0x1b   :  { %v116_v38 = vsel %vm80_vm0, %v101_v33, %v114_v36  ;;  %vm235_vm12 = vcmp.eq.s32.totalorder %v211_v23, %v231_v32 }
  0x1c   :  { %v121_v39 = vmul.f32 1.442695, %v119_v37  ;;  %v120_v40 = vsub.f32 %v65_v1, %v116_v38  ;;  %v216_v1 = vsel %vm215_vm4, %v209_v45, %v212_v50  ;;  %v230_v38 = vperm.slane %v227_v28, 0 }
  0x1d   :  { %v220_v17 = vsel %vm219_vm8, %v216_v1, %v218_v5  ;;  %vm59_vm8 = vcmask 25600  }
  0x1e   :  { %456 = vpow2.f32 %v121_v39  ;;  %v123_v41 = vmul.f32 1.442695, %v120_v40  ;;  %v229_v24 = vperm.slane %v220_v17, 1  ;;  %v228_v29 = vperm.slane %v220_v17, 0  ;;  %61 = vst.msk [vmem:[#allocation3] sm:$0x3] %vm59_vm8, %v476_v34 }
  0x1f   :  { %vm234_vm15 = vcmp.eq.s32.totalorder %v211_v23, %v230_v38  ;;  %60 = vst.msk [vmem:[#allocation2] sm:$0x3] %vm59_vm8, %v476_v34 }
  0x20   :  { %458 = vpow2.f32 %v123_v41  ;;  %vm233_vm10 = vcmp.eq.s32.totalorder %v211_v23, %v229_v24  ;;  %vm232_vm11 = vcmp.eq.s32.totalorder %v211_v23, %v228_v29  ;;  %62 = vst.msk [vmem:[#allocation4] sm:$0x3] %vm59_vm8, %v476_v34 }
  0x21   :  { %v522_v35 = vsel %vm233_vm10, 1.0, %v476_v34  ;;  %v525_v37 = vsel %vm232_vm11, 1.0, %v476_v34  ;;  %63 = vst.msk [vmem:[#allocation5] sm:$0x3] %vm59_vm8, %v476_v34 }
  0x22   :  { %v324_v41 = vsel %vm80_vm0, %v525_v37, 0.0  ;;  %v325_v42 = vsel %vm80_vm0, %v522_v35, 0.0 }
  0x24   :  { %v507_v43 = vpop.eup %456 }
  0x25   :  { %127 = vst [vmem:[#allocation1] ss:$2 sm:$0xff] %v507_v43 }
  0x26   :  { %v510_v44 = vpop.eup %458 }
  0x27   :  { %131 = vst [vmem:[#allocation1 + $0x10] ss:$2 sm:$0xff] %v510_v44 }
  0x2c   :  { %v128_v46 = vld.sshfl [vmem:[#allocation1] sm:$0xff pattern:$0x75316420]  ;;  %v129_v47 = vld.sshfl [vmem:[#allocation1 + $0x8] sm:$0xff pattern:$0x75316420] }
  0x2d   :  { %v138_v48 = vsel %vm80_vm0, %v128_v46, 0.0  ;;  %v145_v49 = vsel %vm80_vm0, %v129_v47, 0.0  ;;  %v326_v46 = vadd.f32 %v325_v42, %v324_v41 }
  0x2e   :  { %v139_v51 = vrot.slane %v138_v48, 4  ;;  %v146_v52 = vrot.slane %v145_v49, 4  ;;  %v132_v55 = vld.sshfl [vmem:[#allocation1 + $0x10] sm:$0xff pattern:$0x75316420] }
  0x2f   :  { %v133_v56 = vld.sshfl [vmem:[#allocation1 + $0x18] sm:$0xff pattern:$0x75316420]  ;;  %v152_v59 = vsel %vm80_vm0, %v132_v55, 0.0  ;;  %327 = vadd.xlane.f32.xlu2 %v326_v46 }
  0x30   :  { %v140_v57 = vadd.f32 %v139_v51, %v138_v48  ;;  %v147_v58 = vadd.f32 %v146_v52, %v145_v49  ;;  %v153_v60 = vrot.slane %v152_v59, 4  ;;  %v159_v61 = vsel %vm80_vm0, %v133_v56, 0.0 }
  0x31   :  { %v160_v0 = vrot.slane %v159_v61, 4  ;;  %v248_v48 = vrot.slane %v522_v35, 4  ;;  %v533_v51 = vsel %vm235_vm12, 1.0, %v476_v34 }
  0x32   :  { %v141_v62 = vrot.slane %v140_v57, 2  ;;  %v148_v63 = vrot.slane %v147_v58, 2  ;;  %v154_v2 = vadd.f32 %v153_v60, %v152_v59  ;;  %v538_v60 = vsel %vm234_vm15, 1.0, %v476_v34 }
  0x33   :  { %v161_v6 = vadd.f32 %v160_v0, %v159_v61  ;;  %v249_v61 = vrot.slane %v533_v51, 4  ;;  %v329_v0 = vsel %vm80_vm0, %v538_v60, 0.0  ;;  %v330_v1 = vsel %vm80_vm0, %v533_v51, 0.0 }
  0x34   :  { %v142_v3 = vadd.f32 %v141_v62, %v140_v57  ;;  %v149_v4 = vadd.f32 %v148_v63, %v147_v58  ;;  %v155_v7 = vrot.slane %v154_v2, 2  ;;  %v250_v57 = vsel %vm80_vm0, %v525_v37, %v248_v48 }
  0x35   :  { %v162_v12 = vrot.slane %v161_v6, 2  ;;  %v251_v8 = vsel %vm80_vm0, %v538_v60, %v249_v61 }
  0x36   :  { %v143_v10 = vrot.slane %v142_v3, 1  ;;  %v150_v11 = vrot.slane %v149_v4, 1  ;;  %v156_v14 = vadd.f32 %v155_v7, %v154_v2 }
  0x37   :  { %v163_v18 = vadd.f32 %v162_v12, %v161_v6 }
  0x38   :  { %v144_v15 = vadd.f32 %v143_v10, %v142_v3  ;;  %v151_v16 = vadd.f32 %v150_v11, %v149_v4  ;;  %v157_v19 = vrot.slane %v156_v14, 1  ;;  %v331_v4 = vadd.f32 %v330_v1, %v329_v0 }
  0x39   :  { %v164_v22 = vrot.slane %v163_v18, 1 }
  0x3a   :  { %v170_v21 = vrot.slane %v151_v16, 4  ;;  %v158_v26 = vadd.f32 %v157_v19, %v156_v14  ;;  %332 = vadd.xlane.f32.xlu2 %v331_v4 }
  0x3b   :  { %v165_v27 = vadd.f32 %v164_v22, %v163_v18 }
  0x3c   :  { %v172_v25 = vsel %vm80_vm0, %v144_v15, %v170_v21 }
  0x3d   :  { %460 = vrcp.f32 %v172_v25  ;;  %v171_v30 = vrot.slane %v165_v27, 4  ;;  %v185_v39 = vand.u32 2147483647, %v172_v25  ;;  %v187_v40 = vand.u32 2147483648, %v172_v25 }
  0x3e   :  { %vm181_vm13 = vweird.f32 %v172_v25 }
  0x3f   :  { %v173_v31 = vsel %vm80_vm0, %v158_v26, %v171_v30  ;;  %vm186_vm2 = vcmp.eq.f32.partialorder %v185_v39, 8.507059e+37  ;;  %v188_v52 = vor.u32 1.1754944e-38, %v187_v40 }
  0x40   :  { %462 = vrcp.f32 %v173_v31  ;;  %vm196_vm3 = vweird.f32 %v173_v31  ;;  %v202_v53 = vand.u32 2147483648, %v173_v31  ;;  %v200_v56 = vand.u32 2147483647, %v173_v31 }
  0x42   :  { %v203_v63 = vor.u32 1.1754944e-38, %v202_v53  ;;  %vm201_vm7 = vcmp.eq.f32.partialorder %v200_v56, 8.507059e+37 }
  0x43   :  { %v461_v33 = vpop.eup %460 }
  0x44   :  { %v177_v36 = vmul.f32 %v461_v33, %v172_v25  ;;  %vm182_vm14 = vweird.f32 %v461_v33 }
  0x45   :  { %vm183_vm1 = vmor %vm181_vm13, %vm182_vm14 }
  0x46   :  { %v178_v45 = vsub.f32 1.0, %v177_v36  ;;  %v463_v47 = vpop.eup %462 }
  0x47   :  { %v192_v50 = vmul.f32 %v463_v47, %v173_v31  ;;  %vm197_vm4 = vweird.f32 %v463_v47 }
  0x48   :  { %v179_v49 = vmul.f32 %v461_v33, %v178_v45  ;;  %vm198_vm5 = vmor %vm196_vm3, %vm197_vm4 }
  0x49   :  { %v193_v55 = vsub.f32 1.0, %v192_v50 }
  0x4a   :  { %v180_v54 = vadd.f32 %v461_v33, %v179_v49 }
  0x4b   :  { %v194_v59 = vmul.f32 %v463_v47, %v193_v55 }
  0x4c   :  { %v184_v58 = vsel %vm183_vm1, %v461_v33, %v180_v54 }
  0x4d   :  { %v189_v62 = vsel %vm186_vm2, %v188_v52, %v184_v58  ;;  %v195_v3 = vadd.f32 %v463_v47, %v194_v59 }
  0x4e   :  { %v190_v2 = vmul.f32 %v507_v43, %v189_v62 }
  0x4f   :  { %v199_v6 = vsel %vm198_vm5, %v463_v47, %v195_v3 }
  0x50   :  { %v254_v5 = vmul.f32 %v250_v57, %v190_v2  ;;  %v204_v7 = vsel %vm201_vm7, %v203_v63, %v199_v6  ;;  %v342_v11 = vmul.f32 1.442695, %v190_v2 }
  0x51   :  { %v205_v9 = vmul.f32 %v510_v44, %v204_v7 }
  0x52   :  { %259 = vst [vmem:[#allocation1] ss:$2 sm:$0xff] %v254_v5  ;;  %464 = vpow2.f32 %v342_v11 }
  0x53   :  { %v255_v10 = vmul.f32 %v251_v8, %v205_v9  ;;  %v344_v12 = vmul.f32 1.442695, %v205_v9 }
  0x55   :  { %263 = vst [vmem:[#allocation1 + $0x10] ss:$2 sm:$0xff] %v255_v10  ;;  %466 = vpow2.f32 %v344_v12 }
  0x58   :  { %v465_v21 = vpop.eup %464 }
  0x59   :  { %v260_v14 = vld.sshfl [vmem:[#allocation1] sm:$0xff pattern:$0x75316420]  ;;  %v261_v15 = vld.sshfl [vmem:[#allocation1 + $0x8] sm:$0xff pattern:$0x75316420] }
  0x5a   :  { %294 = vst [vmem:[#allocation1] ss:$2 sm:$0xff] %v190_v2  ;;  %v270_v43 = vsel %vm80_vm0, %v260_v14, 0.0  ;;  %v271_v16 = vsel %vm80_vm0, %v261_v15, 0.0 }
  0x5b   :  { %v272_v17 = vadd.f32 %v271_v16, %v270_v43  ;;  %v467_v27 = vpop.eup %466 }
  0x5c   :  { %v264_v18 = vld.sshfl [vmem:[#allocation1 + $0x10] sm:$0xff pattern:$0x75316420]  ;;  %v265_v19 = vld.sshfl [vmem:[#allocation1 + $0x18] sm:$0xff pattern:$0x75316420] }
  0x5d   :  { %273 = vadd.xlane.f32.xlu0 %v272_v17  ;;  %298 = vst [vmem:[#allocation1 + $0x10] ss:$2 sm:$0xff] %v205_v9  ;;  %v275_v44 = vsel %vm80_vm0, %v264_v18, 0.0  ;;  %v276_v20 = vsel %vm80_vm0, %v265_v19, 0.0 }
  0x5e   :  { %v277_v24 = vadd.f32 %v276_v20, %v275_v44 }
  0x61   :  { %v295_v22 = vld.sshfl [vmem:[#allocation1] sm:$0xff pattern:$0x75316420]  ;;  %v296_v23 = vld.sshfl [vmem:[#allocation1 + $0x8] sm:$0xff pattern:$0x75316420] }
  0x62   :  { %v305_v25 = vsel %vm80_vm0, %v295_v22, 0.0  ;;  %v306_v26 = vsel %vm80_vm0, %v296_v23, 0.0  ;;  %348 = vst [vmem:[#allocation1] ss:$2 sm:$0xff] %v465_v21 }
  0x63   :  { %v307_v28 = vadd.f32 %v306_v26, %v305_v25  ;;  %v323_v26 = vld [vmem:[#allocation4] sm:$0x3] }
  0x64   :  { %v299_v29 = vld.sshfl [vmem:[#allocation1 + $0x10] sm:$0xff pattern:$0x75316420]  ;;  %v300_v30 = vld.sshfl [vmem:[#allocation1 + $0x18] sm:$0xff pattern:$0x75316420] }
  0x65   :  { %308 = vadd.xlane.f32.xlu1 %v307_v28  ;;  %278 = vadd.xlane.f32.xlu0 %v277_v24  ;;  %v310_v31 = vsel %vm80_vm0, %v299_v29, 0.0  ;;  %v311_v32 = vsel %vm80_vm0, %v300_v30, 0.0  ;;  %352 = vst [vmem:[#allocation1 + $0x10] ss:$2 sm:$0xff] %v467_v27 }
  0x66   :  { %v312_v33 = vadd.f32 %v311_v32, %v310_v31 }
  0x69   :  { %v349_v36 = vld.sshfl [vmem:[#allocation1] sm:$0xff pattern:$0x75316420]  ;;  %v350_v38 = vld.sshfl [vmem:[#allocation1 + $0x8] sm:$0xff pattern:$0x75316420] }
  0x6a   :  { %v359_v39 = vsel %vm80_vm0, %v349_v36, 0.0  ;;  %v366_v40 = vsel %vm80_vm0, %v350_v38, 0.0  ;;  %v256_v36 = vld [vmem:[#allocation2] sm:$0x3] }
  0x6b   :  { %v360_v41 = vrot.slane %v359_v39, 4  ;;  %v367_v42 = vrot.slane %v366_v40, 4 }
  0x6c   :  { %v353_v45 = vld.sshfl [vmem:[#allocation1 + $0x10] sm:$0xff pattern:$0x75316420]  ;;  %v354_v46 = vld.sshfl [vmem:[#allocation1 + $0x18] sm:$0xff pattern:$0x75316420] }
  0x6d   :  { %313 = vadd.xlane.f32.xlu1 %v312_v33  ;;  %v361_v47 = vadd.f32 %v360_v41, %v359_v39  ;;  %v368_v48 = vadd.f32 %v367_v42, %v366_v40  ;;  %v373_v49 = vsel %vm80_vm0, %v353_v45, 0.0  ;;  %v380_v50 = vsel %vm80_vm0, %v354_v46, 0.0  ;;  %v291_v42 = vld [vmem:[#allocation3] sm:$0x3] }
  0x6e   :  { %v374_v52 = vrot.slane %v373_v49, 4  ;;  %v381_v53 = vrot.slane %v380_v50, 4 }
  0x6f   :  { %v362_v54 = vrot.slane %v361_v47, 2  ;;  %v369_v55 = vrot.slane %v368_v48, 2 }
  0x70   :  { %v375_v56 = vadd.f32 %v374_v52, %v373_v49  ;;  %v382_v57 = vadd.f32 %v381_v53, %v380_v50 }
  0x71   :  { %v363_v58 = vadd.f32 %v362_v54, %v361_v47  ;;  %v370_v59 = vadd.f32 %v369_v55, %v368_v48  ;;  %v395_v55 = vld [vmem:[#allocation5] sm:$0x3] }
  0x72   :  { %v376_v61 = vrot.slane %v375_v56, 2  ;;  %v383_v62 = vrot.slane %v382_v57, 2 }
  0x73   :  { %v364_v63 = vrot.slane %v363_v58, 1  ;;  %v371_v0 = vrot.slane %v370_v59, 1 }
  0x74   :  { %v377_v1 = vadd.f32 %v376_v61, %v375_v56  ;;  %v384_v2 = vadd.f32 %v383_v62, %v382_v57 }
  0x75   :  { %v365_v3 = vadd.f32 %v364_v63, %v363_v58  ;;  %v372_v4 = vadd.f32 %v371_v0, %v370_v59 }
  0x76   :  { %v378_v5 = vrot.slane %v377_v1, 1  ;;  %v385_v6 = vrot.slane %v384_v2, 1 }
  0x77   :  { %468 = vlog2.f32 %v365_v3 }
  0x78   :  { %470 = vlog2.f32 %v372_v4  ;;  %v379_v7 = vadd.f32 %v378_v5, %v377_v1  ;;  %v386_v8 = vadd.f32 %v385_v6, %v384_v2 }
  0x7a   :  { %472 = vlog2.f32 %v379_v7 }
  0x7b   :  { %474 = vlog2.f32 %v386_v8 }
  0x7d   :  { %v469_v9 = vpop.eup %468 }
  0x7e   :  { %v471_v10 = vpop.eup %470  ;;  %v388_v11 = vmul.f32 0.6931472, %v469_v9 }
  0x7f   :  { %v390_v12 = vmul.f32 0.6931472, %v471_v10 }
  0x80   :  { %v396_v14 = vmul.f32 %v525_v37, %v388_v11  ;;  %v473_v15 = vpop.eup %472 }
  0x81   :  { %v397_v43 = vmul.f32 %v522_v35, %v390_v12  ;;  %v475_v16 = vpop.eup %474  ;;  %v392_v17 = vmul.f32 0.6931472, %v473_v15 }
  0x82   :  { %v400_v18 = vsel %vm80_vm0, %v396_v14, 0.0  ;;  %v394_v19 = vmul.f32 0.6931472, %v475_v16 }
  0x83   :  { %v401_v44 = vsel %vm80_vm0, %v397_v43, 0.0  ;;  %v398_v20 = vmul.f32 %v538_v60, %v392_v17 }
  0x84   :  { %v402_v21 = vadd.f32 %v401_v44, %v400_v18  ;;  %v399_v22 = vmul.f32 %v533_v51, %v394_v19  ;;  %v283_v51 = vand.u32 127, %v210_v13 }
  0x85   :  { %v405_v23 = vsel %vm80_vm0, %v398_v20, 0.0 }
  0x86   :  { %403 = vadd.xlane.f32.xlu0 %v402_v21  ;;  %v406_v37 = vsel %vm80_vm0, %v399_v22, 0.0 }
  0x87   :  { %v407_v24 = vadd.f32 %v406_v37, %v405_v23 }
  0x89   :  { %408 = vadd.xlane.f32.xlu1 %v407_v24 }
  0xa2   :  { %v328_v35 = vpop.xlane.xlu2 %327 }
  0xa3   :  { %v336_v60 = vperm.slane %v328_v35, %v283_v51 }
  0xad   :  { %v333_v25 = vpop.xlane.xlu2 %332 }
  0xae   :  { %v337_v27 = vperm.slane %v333_v25, %v283_v51 }
  0xb0   :  { %v338_v29 = vsel %vm221_vm6, %v337_v27, %v336_v60 }
  0xb1   :  { %v340_v30 = vadd.f32 %v338_v29, %v323_v26 }
  0xb3   :  { %341 = vst.msk [vmem:[#allocation4] sm:$0x3] %vm59_vm8, %v340_v30 }
  0xba   :  { %v426_v39 = vld [vmem:[#allocation4] sm:$0x3] }
  0xbb   :  { %453 = vst.msk [vmem:[%s604_s2 + $0x4] sm:$0x3] %vm59_vm8, %v426_v39 }
  0xd0   :  { %v274_v28 = vpop.xlane.xlu0 %273 }
  0xd1   :  { %v284_v31 = vperm.slane %v274_v28, %v283_v51 }
  0xd8   :  { %v309_v32 = vpop.xlane.xlu1 %308  ;;  %v279_v33 = vpop.xlane.xlu0 %278 }
  0xd9   :  { %v285_v38 = vperm.slane %v279_v33, %v283_v51  ;;  %v317_v13 = vperm.slane %v309_v32, %v283_v51 }
  0xdb   :  { %v286_v34 = vsel %vm221_vm6, %v285_v38, %v284_v31 }
  0xdc   :  { %v288_v40 = vadd.f32 %v286_v34, %v256_v36 }
  0xde   :  { %290 = vst.msk [vmem:[#allocation2] sm:$0x3] %vm59_vm8, %v288_v40 }
  0xe0   :  { %v314_v41 = vpop.xlane.xlu1 %313 }
  0xe1   :  { %v318_v45 = vperm.slane %v314_v41, %v283_v51 }
  0xe3   :  { %v319_v46 = vsel %vm221_vm6, %v318_v45, %v317_v13 }
  0xe4   :  { %v321_v47 = vadd.f32 %v319_v46, %v291_v42 }
  0xe5   :  { %v421_v48 = vld [vmem:[#allocation2] sm:$0x3] }
  0xe6   :  { %322 = vst.msk [vmem:[#allocation3] sm:$0x3] %vm59_vm8, %v321_v47 }
  0xe7   :  { %422 = vst.msk [vmem:[%s604_s2] sm:$0x3] %vm59_vm8, %v421_v48 }
  0xed   :  { %v423_v49 = vld [vmem:[#allocation3] sm:$0x3] }
  0xee   :  { %452 = vst.msk [vmem:[%s604_s2 + $0x2] sm:$0x3] %vm59_vm8, %v423_v49 }
  0xf9   :  { %v404_v50 = vpop.xlane.xlu0 %403 }
  0xfa   :  { %v412_v52 = vperm.slane %v404_v50, %v283_v51 }
  0xfc   :  { %v409_v53 = vpop.xlane.xlu1 %408 }
  0xfd   :  { %v413_v54 = vperm.slane %v409_v53, %v283_v51 }
  0xff   :  { %v414_v56 = vsel %vm221_vm6, %v413_v54, %v412_v52 }
 0x100   :  { %v416_v57 = vadd.f32 %v414_v56, %v395_v55 }
 0x102   :  { %417 = vst.msk [vmem:[#allocation5] sm:$0x3] %vm59_vm8, %v416_v57 }
 0x109   :  { %v429_v58 = vld [vmem:[#allocation5] sm:$0x3] }
 0x10a   :  { %454 = vst.msk [vmem:[%s604_s2 + $0x6] sm:$0x3] %vm59_vm8, %v429_v58 }

</bundles_post_ra>
